<compile_context>
chip_gen: v7x
topology: tpu7x:2x2x1
jax: 0.10.0
libtpu: 0.0.40
codegen_flags: <defaults>
</compile_context>

<pallas_src>
import math

import jax
import jax.numpy as jnp
from jax.experimental import pallas as pl
from jax.experimental.pallas import tpu as pltpu


# ---------------------------------------------------------------------------
# Kernel
# ---------------------------------------------------------------------------
def _make_ffn_kernel(acc_in_out, matmul_dtype):
    """Builds the fused FFN kernel.

    acc_in_out: accumulate directly into the (f32) output block -- it is
      resident across the hidden/reduction grid axis -- instead of a VMEM
      scratch accumulator (saves tm*emb*4 bytes).
    matmul_dtype: optional cast (e.g. bf16) fed to the MXU; accumulation,
      bias add and GELU stay in f32.
    """

    def kernel(x_ref, w_in_ref, b_in_ref, w_out_ref, b_out_ref, o_ref, *scratch):
        acc_ref = o_ref if acc_in_out else scratch[0]
        j = pl.program_id(1)

        @pl.when(j == 0)
        def _init():
            acc_ref[...] = jnp.zeros_like(acc_ref)

        x = x_ref[...]
        w_in = w_in_ref[...]
        w_out = w_out_ref[...]
        if matmul_dtype is not None:
            x = x.astype(matmul_dtype)
            w_in = w_in.astype(matmul_dtype)
            w_out = w_out.astype(matmul_dtype)

        # first projection + bias + GELU, f32 accumulation (MXU output type)
        h = jnp.dot(x, w_in, preferred_element_type=jnp.float32)
        h = h + b_in_ref[...].astype(jnp.float32)
        # TODO(synk): PyTorch F.gelu defaults to the exact erf formulation; the
        # tanh approximation (EUP-friendly) is used here, max abs dev ~1e-3.
        h = jax.nn.gelu(h, approximate=True)

        # second projection: partial product over the hidden axis.
        # NOTE: partial row tiles (rows % tm != 0) compute on padded garbage
        # rows; this is safe because rows are independent and the writeback of
        # out-of-range rows is masked.
        acc_ref[...] += jnp.dot(h.astype(w_out.dtype), w_out,
                                preferred_element_type=jnp.float32)

        @pl.when(j == pl.num_programs(1) - 1)
        def _finalize():
            o_ref[...] = (acc_ref[...] + b_out_ref[...].astype(jnp.float32)
                          ).astype(o_ref.dtype)

    return kernel


# ---------------------------------------------------------------------------
# Hardware queries / tile selection
# ---------------------------------------------------------------------------
def _round_up(n, m):
    return ((n + m - 1) // m) * m


def _vmem_capacity_bytes():
    try:
        return int(pltpu.get_tpu_info().vmem_capacity_bytes)
    except Exception:  # interpret mode / non-TPU backend / older jax
        return 64 * 1024 * 1024  # conservative: v7x per-core capacity


def _num_tensorcores():
    """Best-effort TensorCore-per-chip count (v5e/v6e: 1, v7x: 2)."""
    try:
        info = pltpu.get_tpu_info()
    except Exception:
        return 1
    for name in ("num_cores", "core_count", "num_tensorcores",
                 "tensorcores_per_chip", "cores_per_chip"):
        v = getattr(info, name, None)
        if isinstance(v, int) and v > 0:
            return v
    return 1


def _sublane(dtype):
    b = jnp.dtype(dtype).itemsize
    return 8 if b >= 4 else (16 if b == 2 else 32)


def _pick_tiles(rows, emb, hidden, x_dtype, w_dtype, out_dtype, acc_in_out):
    """Derive (row_tile, hidden_tile, row_grid, vmem_limit_bytes)."""
    xb = jnp.dtype(x_dtype).itemsize
    wb = jnp.dtype(w_dtype).itemsize
    ob = jnp.dtype(out_dtype).itemsize
    sub = max(_sublane(x_dtype), _sublane(out_dtype))

    vmem_cap = _vmem_capacity_bytes()
    num_cores = _num_tensorcores()
    budget = vmem_cap // 2  # headroom for compiler-internal scratch

    def weight_bytes(t):
        if t == hidden:
            # Block index is constant over the whole grid -> weights are
            # DMA'd into VMEM exactly once and are NOT double-buffered.
            return 2 * hidden * emb * wb + (hidden + emb) * 4
        # double-buffered W_in column + W_out row tiles (+ b_in tile, b_out)
        return 2 * (2 * t * emb * wb + t * 4) + emb * 4

    def per_row_bytes(t):
        c = 2 * emb * xb          # x tile (double-buffered)
        c += 2 * emb * ob         # output tile (double-buffered)
        if not acc_in_out:
            c += emb * 4          # separate f32 accumulator scratch
        c += 2 * t * 4            # h = gelu(x @ W_in) f32 temp + cast copy
        c += emb * wb             # in-kernel cast of x to the matmul dtype
        return c

    # --- hidden (reduction) tile -------------------------------------------
    # Strongly prefer th == hidden: weights stay resident for the whole
    # kernel (single DMA, single reduction step, no acc read-modify-write).
    weight_budget = budget // 2
    if weight_bytes(hidden) <= weight_budget:
        th = hidden
    else:
        # 256-aligned divisors first (fills the 2x256x256 MXUs of v6e/v7x),
        # then 128-aligned (enough for v5e's 4x128x128 MXU).
        th = None
        for step in (256, 128):
            best, d = None, step
            while d < hidden:
                if hidden % d == 0 and weight_bytes(d) <= weight_budget:
                    best = d
                d += step
            if best is not None:
                th = best
                break
        if th is None:
            th = 128 if hidden % 128 == 0 else hidden  # last resort
    fixed = weight_bytes(th)

    # --- row tile ------------------------------------------------------------
    rows_pad = _round_up(rows, sub)
    tm = max(budget - fixed, 0) // per_row_bytes(th)
    tm = int(tm) // sub * sub
    tm = max(sub, min(tm, 1024, rows_pad))
    grid_rows = pl.cdiv(rows, tm)

    # Only split rows on multi-TensorCore chips (v7x): the row axis is marked
    # "parallel" and shards across cores there.  On single-TC v5e/v6e a split
    # just re-streams the weights (when th < hidden) and adds per-step
    # pipeline overhead for zero parallelism gain.
    if num_cores > 1:
        target = _round_up(max(grid_rows, num_cores), num_cores)
        tm_split = max(sub, _round_up(pl.cdiv(rows, target), sub))
        if tm_split < tm:
            tm = tm_split
            grid_rows = pl.cdiv(rows, tm)

    # VMEM limit derived from the actual block footprint (2x margin for
    # compiler-internal temporaries), never above this generation's capacity.
    used = fixed + tm * per_row_bytes(th)
    vmem_limit = int(min(vmem_cap, max(2 * used, 32 * 1024 * 1024)))
    return tm, th, grid_rows, vmem_limit


# ---------------------------------------------------------------------------
# Wrapper
# ---------------------------------------------------------------------------
def feed_forward(x, w_in, b_in, w_out, b_out, *, use_bf16_matmul=False):
    """y = gelu(x @ w_in + b_in) @ w_out + b_out.

    x: [..., emb]; w_in: [emb, hidden]; b_in: [hidden];
    w_out: [hidden, emb]; b_out: [emb].
    """
    orig_shape = x.shape
    emb = orig_shape[-1]
    hidden = w_in.shape[-1]
    assert w_in.shape == (emb, hidden) and w_out.shape == (hidden, emb)
    assert b_in.shape == (hidden,) and b_out.shape == (emb,)

    rows = math.prod(orig_shape[:-1]) if len(orig_shape) > 1 else 1
    x2 = x.reshape(rows, emb)

    # Lane-density guard: pad emb / hidden to multiples of 128 so every MXU /
    # VPU op and the output store are lane-dense.  Zero pads are inert: padded
    # weight rows/cols and biases are zero, and the padded output columns are
    # sliced off below.
    emb_p = _round_up(emb, 128)
    hid_p = _round_up(hidden, 128)
    if emb_p != emb or hid_p != hidden:
        x2 = jnp.pad(x2, ((0, 0), (0, emb_p - emb)))
        w_in = jnp.pad(w_in, ((0, emb_p - emb), (0, hid_p - hidden)))
        b_in = jnp.pad(b_in, (0, hid_p - hidden))
        w_out = jnp.pad(w_out, ((0, hid_p - hidden), (0, emb_p - emb)))
        b_out = jnp.pad(b_out, (0, emb_p - emb))

    out_dtype = x.dtype
    # Optional bf16 MXU path: cast the (reused) weights once in the wrapper;
    # x is cast per tile inside the kernel.  Accumulation / bias / GELU stay
    # in f32.  f32 through the MXU runs at a fraction of the bf16 rate.
    matmul_dtype = None
    if use_bf16_matmul and jnp.dtype(x.dtype) == jnp.float32:
        matmul_dtype = jnp.bfloat16
        w_in = w_in.astype(jnp.bfloat16)
        w_out = w_out.astype(jnp.bfloat16)

    b_in2 = b_in.reshape(1, hid_p).astype(jnp.float32)
    b_out2 = b_out.reshape(1, emb_p).astype(jnp.float32)

    # f32 outputs double as the reduction accumulator (no separate scratch).
    acc_in_out = jnp.dtype(out_dtype) == jnp.float32

    tm, th, grid_rows, vmem_limit = _pick_tiles(
        rows, emb_p, hid_p, x2.dtype, w_in.dtype, out_dtype, acc_in_out)
    n_j = hid_p // th
    grid = (grid_rows, n_j)

    x_bytes = jnp.dtype(x2.dtype).itemsize
    w_bytes = jnp.dtype(w_in.dtype).itemsize
    # When th < hidden the weight tiles are re-streamed for every row tile.
    weight_passes = grid_rows if n_j > 1 else 1
    cost = pl.CostEstimate(
        flops=4 * rows * emb_p * hid_p,                 # two matmuls
        transcendentals=rows * hid_p,                   # tanh per hidden elem
        bytes_accessed=(x_bytes * 2 * rows * emb_p
                        + w_bytes * weight_passes * 2 * emb_p * hid_p
                        + 4 * (hid_p + emb_p)),
    )

    kernel = _make_ffn_kernel(acc_in_out, matmul_dtype)
    scratch_shapes = [] if acc_in_out else [pltpu.VMEM((tm, emb_p), jnp.float32)]

    out = pl.pallas_call(
        kernel,
        out_shape=jax.ShapeDtypeStruct((rows, emb_p), out_dtype),
        grid=grid,
        in_specs=[
            pl.BlockSpec((tm, emb_p), lambda i, j: (i, 0)),   # x row tile
            pl.BlockSpec((emb_p, th), lambda i, j: (0, j)),   # W_in column tile
            pl.BlockSpec((1, th),     lambda i, j: (0, j)),   # b_in tile
            pl.BlockSpec((th, emb_p), lambda i, j: (j, 0)),   # W_out row tile
            pl.BlockSpec((1, emb_p),  lambda i, j: (0, 0)),   # b_out
        ],
        out_specs=pl.BlockSpec((tm, emb_p), lambda i, j: (i, 0)),
        scratch_shapes=scratch_shapes,
        compiler_params=pltpu.CompilerParams(
            dimension_semantics=("parallel", "arbitrary"),
            vmem_limit_bytes=vmem_limit,
        ),
        cost_estimate=cost,
        # NOTE: if profiling ever shows exposed weight DMA when th < hidden,
        # set pipeline_mode=pl.Buffered(3) on the W_in / W_out specs.
    )(x2, w_in, b_in2, w_out, b_out2)

    if emb_p != emb:
        out = out[:, :emb]
    return out.reshape(orig_shape)


# ---------------------------------------------------------------------------
# Reference
# ---------------------------------------------------------------------------
def feed_forward_ref(x, w_in, b_in, w_out, b_out):
    xf = x.astype(jnp.float32)
    h = xf @ w_in.astype(jnp.float32) + b_in.astype(jnp.float32)
    h = jax.nn.gelu(h, approximate=True)
    y = h @ w_out.astype(jnp.float32) + b_out.astype(jnp.float32)
    return y.astype(x.dtype)


if __name__ == "__main__":
    batch, seq, emb, mult = 2, 8, 32, 4
    hidden = emb * mult

    key = jax.random.PRNGKey(0)
    kx, k1, k2, k3, k4 = jax.random.split(key, 5)
    x = jax.random.normal(kx, (batch, seq, emb), dtype=jnp.float32)

    # nn.Linear-style uniform init (deterministic)
    lim_in = 1.0 / (emb ** 0.5)
    w_in = jax.random.uniform(k1, (emb, hidden), jnp.float32, -lim_in, lim_in)
    b_in = jax.random.uniform(k2, (hidden,), jnp.float32, -lim_in, lim_in)
    lim_out = 1.0 / (hidden ** 0.5)
    w_out = jax.random.uniform(k3, (hidden, emb), jnp.float32, -lim_out, lim_out)
    b_out = jax.random.uniform(k4, (emb,), jnp.float32, -lim_out, lim_out)

    y_ref = feed_forward_ref(x, w_in, b_in, w_out, b_out)

    # f32 MXU path (matches the f32 reference tightly)
    y = jax.block_until_ready(feed_forward(x, w_in, b_in, w_out, b_out))
    assert y.shape == x.shape and y.dtype == x.dtype
    assert jnp.allclose(y, y_ref, atol=1e-4, rtol=1e-4), "f32 path mismatch"

    # bf16 MXU fast path (looser tolerance from bf16 rounding of the matmuls)
    y_bf16 = jax.block_until_ready(
        feed_forward(x, w_in, b_in, w_out, b_out, use_bf16_matmul=True))
    assert y_bf16.shape == x.shape and y_bf16.dtype == x.dtype
    assert jnp.allclose(y_bf16, y_ref, atol=5e-2, rtol=5e-2), "bf16 path mismatch"

    print("KERNEL_OK")
</pallas_src>

<mosaic_0001>
module attributes {stable_mosaic.version = 11 : i64} {
  func.func @kernel(%arg0: i32, %arg1: i32, %arg2: memref<16x128xf32, #tpu.memory_space<vmem>>, %arg3: memref<128x128xf32, #tpu.memory_space<vmem>>, %arg4: memref<1x128xf32, #tpu.memory_space<vmem>>, %arg5: memref<128x128xf32, #tpu.memory_space<vmem>>, %arg6: memref<1x128xf32, #tpu.memory_space<vmem>>, %arg7: memref<16x128xf32, #tpu.memory_space<vmem>>) attributes {dimension_semantics = [#tpu.dimension_semantics<parallel>, #tpu.dimension_semantics<arbitrary>], iteration_bounds = array<i64: 1, 1>, scalar_prefetch = 0 : i64, scratch_operands = 0 : i64, tpu.core_type = #tpu.core_type<tc>, window_params = [{transform_indices = @transform_0, window_bounds = array<i64: 16, 128>}, {transform_indices = @transform_1, window_bounds = array<i64: 128, 128>}, {transform_indices = @transform_2, window_bounds = array<i64: 1, 128>}, {transform_indices = @transform_3, window_bounds = array<i64: 128, 128>}, {pipeline_mode = #tpu.pipeline_mode<synchronous>, transform_indices = @transform_4, window_bounds = array<i64: 1, 128>}, {transform_indices = @transform_5, window_bounds = array<i64: 16, 128>}]} {
    %c0_i32 = arith.constant 0 : i32
    %0 = arith.cmpi eq, %arg1, %c0_i32 : i32
    %1 = arith.extui %0 : i1 to i32
    %c0_i32_0 = arith.constant 0 : i32
    %2 = arith.cmpi ne, %1, %c0_i32_0 : i32
    scf.if %2 {
      %cst_19 = arith.constant 0.000000e+00 : f32
      %30 = vector.broadcast %cst_19 : f32 to vector<16x128xf32>
      %c0_20 = arith.constant 0 : index
      %c0_21 = arith.constant 0 : index
      %31 = vector.load %arg7[%c0_20, %c0_21] : memref<16x128xf32, #tpu.memory_space<vmem>>, vector<16x128xf32>
      tpu.vector_store %arg7[%c0_20, %c0_21], %30 {strides = array<i32>} : memref<16x128xf32, #tpu.memory_space<vmem>>, vector<16x128xf32>,
    } else {
    }
    %c0 = arith.constant 0 : index
    %c0_1 = arith.constant 0 : index
    %3 = vector.load %arg2[%c0, %c0_1] : memref<16x128xf32, #tpu.memory_space<vmem>>, vector<16x128xf32>
    %c0_2 = arith.constant 0 : index
    %c0_3 = arith.constant 0 : index
    %4 = vector.load %arg3[%c0_2, %c0_3] : memref<128x128xf32, #tpu.memory_space<vmem>>, vector<128x128xf32>
    %c0_4 = arith.constant 0 : index
    %c0_5 = arith.constant 0 : index
    %5 = vector.load %arg5[%c0_4, %c0_5] : memref<128x128xf32, #tpu.memory_space<vmem>>, vector<128x128xf32>
    %cst = arith.constant dense<0.000000e+00> : vector<16x128xf32>
    %6 = tpu.matmul %3, %4, %cst {dimension_numbers = #tpu.dot_dimension_numbers<[1], [0], [0], [1], [0, 0, 1, 1], [], []>} : vector<16x128xf32>, vector<128x128xf32>, vector<16x128xf32> -> vector<16x128xf32>
    %c0_6 = arith.constant 0 : index
    %c0_7 = arith.constant 0 : index
    %7 = vector.load %arg4[%c0_6, %c0_7] : memref<1x128xf32, #tpu.memory_space<vmem>>, vector<1x128xf32>
    %8 = vector.broadcast %7 : vector<1x128xf32> to vector<16x128xf32>
    %9 = arith.addf %6, %8 : vector<16x128xf32>
    %10 = arith.mulf %9, %9 : vector<16x128xf32>
    %11 = arith.mulf %9, %10 : vector<16x128xf32>
    %cst_8 = arith.constant 4.471500e-02 : f32
    %12 = vector.broadcast %cst_8 : f32 to vector<16x128xf32>
    %13 = arith.mulf %12, %11 : vector<16x128xf32>
    %14 = arith.addf %9, %13 : vector<16x128xf32>
    %cst_9 = arith.constant 0.797884583 : f32
    %15 = vector.broadcast %cst_9 : f32 to vector<16x128xf32>
    %16 = arith.mulf %15, %14 : vector<16x128xf32>
    %17 = math.tanh %16 : vector<16x128xf32>
    %cst_10 = arith.constant 1.000000e+00 : f32
    %18 = vector.broadcast %cst_10 : f32 to vector<16x128xf32>
    %19 = arith.addf %18, %17 : vector<16x128xf32>
    %cst_11 = arith.constant 5.000000e-01 : f32
    %20 = vector.broadcast %cst_11 : f32 to vector<16x128xf32>
    %21 = arith.mulf %20, %19 : vector<16x128xf32>
    %22 = arith.mulf %9, %21 : vector<16x128xf32>
    %c0_12 = arith.constant 0 : index
    %c0_13 = arith.constant 0 : index
    %23 = vector.load %arg7[%c0_12, %c0_13] : memref<16x128xf32, #tpu.memory_space<vmem>>, vector<16x128xf32>
    %cst_14 = arith.constant dense<0.000000e+00> : vector<16x128xf32>
    %24 = tpu.matmul %22, %5, %cst_14 {dimension_numbers = #tpu.dot_dimension_numbers<[1], [0], [0], [1], [0, 0, 1, 1], [], []>} : vector<16x128xf32>, vector<128x128xf32>, vector<16x128xf32> -> vector<16x128xf32>
    %25 = arith.addf %23, %24 : vector<16x128xf32>
    %c0_15 = arith.constant 0 : index
    %c0_16 = arith.constant 0 : index
    %26 = vector.load %arg7[%c0_15, %c0_16] : memref<16x128xf32, #tpu.memory_space<vmem>>, vector<16x128xf32>
    tpu.vector_store %arg7[%c0_15, %c0_16], %25 {strides = array<i32>} : memref<16x128xf32, #tpu.memory_space<vmem>>, vector<16x128xf32>,
    %c0_i32_17 = arith.constant 0 : i32
    %27 = arith.cmpi eq, %arg1, %c0_i32_17 : i32
    %28 = arith.extui %27 : i1 to i32
    %c0_i32_18 = arith.constant 0 : i32
    %29 = arith.cmpi ne, %28, %c0_i32_18 : i32
    scf.if %29 {
      %c0_19 = arith.constant 0 : index
      %c0_20 = arith.constant 0 : index
      %30 = vector.load %arg7[%c0_19, %c0_20] : memref<16x128xf32, #tpu.memory_space<vmem>>, vector<16x128xf32>
      %c0_21 = arith.constant 0 : index
      %c0_22 = arith.constant 0 : index
      %31 = vector.load %arg6[%c0_21, %c0_22] : memref<1x128xf32, #tpu.memory_space<vmem>>, vector<1x128xf32>
      %32 = vector.broadcast %31 : vector<1x128xf32> to vector<16x128xf32>
      %33 = arith.addf %30, %32 : vector<16x128xf32>
      %c0_23 = arith.constant 0 : index
      %c0_24 = arith.constant 0 : index
      %34 = vector.load %arg7[%c0_23, %c0_24] : memref<16x128xf32, #tpu.memory_space<vmem>>, vector<16x128xf32>
      tpu.vector_store %arg7[%c0_23, %c0_24], %33 {strides = array<i32>} : memref<16x128xf32, #tpu.memory_space<vmem>>, vector<16x128xf32>,
    } else {
    }
    return
  }
  func.func @transform_0(%arg0: i32, %arg1: i32) -> (i32, i32) {
    %c0_i32 = arith.constant 0 : i32
    %c0_i32_0 = arith.constant 0 : i32
    return %arg0, %c0_i32 : i32, i32
  }
  func.func @transform_1(%arg0: i32, %arg1: i32) -> (i32, i32) {
    %c0_i32 = arith.constant 0 : i32
    %c0_i32_0 = arith.constant 0 : i32
    return %c0_i32, %arg1 : i32, i32
  }
  func.func @transform_2(%arg0: i32, %arg1: i32) -> (i32, i32) {
    %c0_i32 = arith.constant 0 : i32
    %c0_i32_0 = arith.constant 0 : i32
    return %c0_i32, %arg1 : i32, i32
  }
  func.func @transform_3(%arg0: i32, %arg1: i32) -> (i32, i32) {
    %c0_i32 = arith.constant 0 : i32
    %c0_i32_0 = arith.constant 0 : i32
    return %arg1, %c0_i32 : i32, i32
  }
  func.func @transform_4(%arg0: i32, %arg1: i32) -> (i32, i32) {
    %c0_i32 = arith.constant 0 : i32
    %c0_i32_0 = arith.constant 0 : i32
    %c0_i32_1 = arith.constant 0 : i32
    return %c0_i32, %c0_i32_0 : i32, i32
  }
  func.func @transform_5(%arg0: i32, %arg1: i32) -> (i32, i32) {
    %c0_i32 = arith.constant 0 : i32
    %c0_i32_0 = arith.constant 0 : i32
    return %arg0, %c0_i32 : i32, i32
  }
}

</mosaic_0001>

<bundles_post_ra>
// kernel: tpu_custom_call.1
= control target key start
LH: loop header
LB: loop body
LE: loop exit
PB: predicated region body
PF: predicated region fallthrough
CT: control target
= control target key end

     0   :  { %10 = vsyncpa [#allocation3], 0  ;;  %s703_s0 = inlined_call_operand.hbm [shape: f32[16,128], index: 0, kind: input, shape index: {}]   ;;  %s704_s1 = inlined_call_operand.hbm [shape: f32[128,128], index: 1, kind: input, shape index: {}]   ;;  %s705_s2 = inlined_call_operand.vmem [shape: f32[1,128], index: 2, kind: input, shape index: {}]   ;;  %s706_s3 = inlined_call_operand.hbm [shape: f32[128,128], index: 3, kind: input, shape index: {}]   ;;  %s707_s4 = inlined_call_operand.vmem [shape: f32[1,128], index: 4, kind: input, shape index: {}]   ;;  %s708_s5 = inlined_call_operand.hbm [shape: f32[16,128], index: 5, kind: output, shape index: {}]  }
   0x1   :  { %11 = vsyncpa [#allocation6], 0 }
   0x2   :  { %12 = vsyncpa [#allocation4], 0  ;;  %s594_s18 = smov [#allocation5]   ;;  %s595_s20 = smov [#allocation2]  }
   0x3   :  { %s30_s19 = sshll.u32 %s594_s18, 4  ;;  %s18_s21 = sshll.u32 %s595_s20, 4  ;;  %s31_s19 = int_to_ptr.vmem [resolvable:$true] %s30_s19  ;;  %s630_s21 = int_to_ptr.vmem [resolvable:$true] %s18_s21 }
   0x4   :  { %s500_s24 = scalar_lea.hbm %s704_s1, 2048 }
   0x5   :  { %p501_p0 = scmp.ne.s32.totalorder %s704_s1, %s500_s24  ;;  %p504_p1 = scmp.lt.u32.totalorder %s500_s24, %s704_s1 }
   0x7   :  { %p506_p2 = pnand %p504_p1, %p501_p0 }
   0x9   :  { %509 = shalt.err (!%p506_p2)
}
   0xa   :  { %s510_s29 = scalar_lea.vmem %s31_s19, 2048  ;;  %p515_p4 = scmp.lt.s32.totalorder %s31_s19, %s31_s19 }
   0xb   :  { %p511_p3 = scmp.ne.s32.totalorder %s31_s19, %s510_s29  ;;  %p516_p5 = scmp.lt.s32.totalorder %s510_s29, %s510_s29 }
   0xd   :  { %p517_p6 = por %p516_p5, %p515_p4 }
   0xf   :  { %p518_p7 = pnand %p517_p6, %p511_p3 }
  0x11   :  { %521 = shalt.err (!%p518_p7)
}
  0x12   :  { %s596_s30 = smov 128   ;;  %s597_s6 = smov 8  }
  0x13   :  { %36 = dma.hbm_to_vmem [thread:$0]  %s704_s1, 2048, %s31_s19, [#allocation6], %s596_s30, %s596_s30, %s597_s6  }
  0x14   :  { %s522_s11 = scalar_lea.hbm %s703_s0, 256 }
  0x15   :  { %p523_p8 = scmp.ne.s32.totalorder %s703_s0, %s522_s11  ;;  %p526_p9 = scmp.lt.u32.totalorder %s522_s11, %s703_s0 }
  0x17   :  { %p528_p10 = pnand %p526_p9, %p523_p8 }
  0x19   :  { %531 = shalt.err (!%p528_p10)
}
  0x1a   :  { %s532_s16 = scalar_lea.vmem %s630_s21, 256  ;;  %p537_p12 = scmp.lt.s32.totalorder %s630_s21, %s630_s21 }
  0x1b   :  { %p533_p11 = scmp.ne.s32.totalorder %s630_s21, %s532_s16  ;;  %p538_p13 = scmp.lt.s32.totalorder %s532_s16, %s532_s16 }
  0x1d   :  { %p539_p0 = por %p538_p13, %p537_p12 }
  0x1f   :  { %p540_p1 = pnand %p539_p0, %p533_p11 }
  0x21   :  { %543 = shalt.err (!%p540_p1)
}
  0x22   :  { %24 = dma.hbm_to_vmem [thread:$0]  %s703_s0, 256, %s630_s21, [#allocation3], %s596_s30, %s596_s30, %s597_s6  }
  0x23   :  { %s598_s18 = smov [#allocation7]   ;;  %s544_s23 = scalar_lea.hbm %s706_s3, 2048 }
  0x24   :  { %s44_s19 = sshll.u32 %s598_s18, 4  ;;  %p545_p2 = scmp.ne.s32.totalorder %s706_s3, %s544_s23  ;;  %s45_s19 = int_to_ptr.vmem [resolvable:$true] %s44_s19 }
  0x25   :  { %p548_p3 = scmp.lt.u32.totalorder %s544_s23, %s706_s3 }
  0x27   :  { %p550_p4 = pnand %p548_p3, %p545_p2 }
  0x29   :  { %553 = shalt.err (!%p550_p4)
}
  0x2a   :  { %s554_s28 = scalar_lea.vmem %s45_s19, 2048  ;;  %p559_p6 = scmp.lt.s32.totalorder %s45_s19, %s45_s19 }
  0x2b   :  { %p555_p5 = scmp.ne.s32.totalorder %s45_s19, %s554_s28  ;;  %p560_p7 = scmp.lt.s32.totalorder %s554_s28, %s554_s28 }
  0x2d   :  { %p561_p8 = por %p560_p7, %p559_p6 }
  0x2f   :  { %p562_p9 = pnand %p561_p8, %p555_p5 }
  0x31   :  { %565 = shalt.err (!%p562_p9)
}
  0x32   :  { %50 = dma.hbm_to_vmem [thread:$0]  %s706_s3, 2048, %s45_s19, [#allocation6], %s596_s30, %s596_s30, %s597_s6  }
  0x33   :  { %588 = dma.done.wait [#allocation3], 256  }
  0x34   :  { %589 = vsyncadd [#allocation3], 4294967040 }
  0x35   :  { %590 = dma.done.wait [#allocation6], 4096  }
  0x36   :  { %591 = vsyncadd [#allocation6], 4294963200  ;;  %v70_v0 = vld [vmem:[#allocation5] sm:$0xff]  ;;  %v71_v1 = vld [vmem:[#allocation5 + $0x8] sm:$0xff]  ;;  %s599_s8 = smov [#allocation8]  }
  0x37   :  { %v72_v2 = vld [vmem:[#allocation5 + $0x10] sm:$0xff]  ;;  %v425_v3 = vpack.c.bf16 %v71_v1, %v70_v0  ;;  %v73_v4 = vld [vmem:[#allocation5 + $0x18] sm:$0xff]  ;;  %v74_v6 = vld [vmem:[#allocation5 + $0x20] sm:$0xff]  ;;  %s304_s9 = sshll.u32 %s599_s8, 4  ;;  %s305_s9 = int_to_ptr.vmem [resolvable:$true] %s304_s9 }
  0x38   :  { %v429_v5 = vpack.c.bf16 %v73_v4, %v72_v2  ;;  %v75_v7 = vld [vmem:[#allocation5 + $0x28] sm:$0xff]  ;;  %v68_v9 = vld [vmem:[#allocation2] sm:$0xff]  ;;  %v77_v11 = vld [vmem:[#allocation5 + $0x38] sm:$0xff]  ;;  %s566_s10 = scalar_lea.vmem %s305_s9, 256  ;;  %p571_p11 = scmp.lt.s32.totalorder %s305_s9, %s305_s9 }
  0x39   :  { %426 = vmatprep.subr.bf16.mxu0 %v425_v3  ;;  %v433_v8 = vpack.c.bf16 %v75_v7, %v74_v6  ;;  %v76_v10 = vld [vmem:[#allocation5 + $0x30] sm:$0xff]  ;;  %387 = vmatprep.mubr.f32.mxu0 %v68_v9  ;;  %v78_v13 = vld [vmem:[#allocation5 + $0x40] sm:$0xff]  ;;  %v79_v14 = vld [vmem:[#allocation5 + $0x48] sm:$0xff]  ;;  %p567_p10 = scmp.ne.s32.totalorder %s305_s9, %s566_s10  ;;  %p572_p12 = scmp.lt.s32.totalorder %s566_s10, %s566_s10 }
  0x3a   :  { %428 = vmatpush3.bf16.msra.mxu0 %v425_v3  ;;  %v437_v12 = vpack.c.bf16 %v77_v11, %v76_v10  ;;  %v441_v15 = vpack.c.bf16 %v79_v14, %v78_v13  ;;  %v80_v16 = vld [vmem:[#allocation5 + $0x50] sm:$0xff]  ;;  %v81_v17 = vld [vmem:[#allocation5 + $0x58] sm:$0xff]  ;;  %v82_v19 = vld [vmem:[#allocation5 + $0x60] sm:$0xff] }
  0x3b   :  { %430 = vmatprep.subr.bf16.mxu0 %v429_v5  ;;  %v445_v18 = vpack.c.bf16 %v81_v17, %v80_v16  ;;  %v83_v20 = vld [vmem:[#allocation5 + $0x68] sm:$0xff]  ;;  %v84_v22 = vld [vmem:[#allocation5 + $0x70] sm:$0xff]  ;;  %v85_v23 = vld [vmem:[#allocation5 + $0x78] sm:$0xff]  ;;  %p573_p13 = por %p572_p12, %p571_p11 }
  0x3c   :  { %v449_v21 = vpack.c.bf16 %v83_v20, %v82_v19  ;;  %v453_v24 = vpack.c.bf16 %v85_v23, %v84_v22  ;;  %v69_v25 = vld [vmem:[#allocation2 + $0x8] sm:$0xff]  ;;  %v86_v26 = vld [vmem:[#allocation7] sm:$0xff]  ;;  %v87_v27 = vld [vmem:[#allocation7 + $0x8] sm:$0xff] }
  0x3d   :  { %v457_v28 = vpack.c.bf16 %v87_v27, %v86_v26  ;;  %v88_v29 = vld [vmem:[#allocation7 + $0x10] sm:$0xff]  ;;  %v89_v30 = vld [vmem:[#allocation7 + $0x18] sm:$0xff]  ;;  %v90_v32 = vld [vmem:[#allocation7 + $0x20] sm:$0xff]  ;;  %p574_p0 = pnand %p573_p13, %p567_p10 }
  0x3e   :  { %432 = vmatpush3.bf16.msra.mxu0 %v429_v5  ;;  %v461_v31 = vpack.c.bf16 %v89_v30, %v88_v29  ;;  %v91_v33 = vld [vmem:[#allocation7 + $0x28] sm:$0xff]  ;;  %v92_v35 = vld [vmem:[#allocation7 + $0x30] sm:$0xff]  ;;  %v93_v36 = vld [vmem:[#allocation7 + $0x38] sm:$0xff] }
  0x3f   :  { %434 = vmatprep.subr.bf16.mxu0 %v433_v8  ;;  %458 = vmatprep.subr.bf16.mxu1 %v457_v28  ;;  %v465_v34 = vpack.c.bf16 %v91_v33, %v90_v32  ;;  %v469_v37 = vpack.c.bf16 %v93_v36, %v92_v35  ;;  %v94_v38 = vld [vmem:[#allocation7 + $0x40] sm:$0xff]  ;;  %v95_v39 = vld [vmem:[#allocation7 + $0x48] sm:$0xff]  ;;  %v96_v40 = vld [vmem:[#allocation7 + $0x50] sm:$0xff] }
  0x40   :  { %460 = vmatpush3.bf16.msra.mxu1 %v457_v28  ;;  %v473_v41 = vpack.c.bf16 %v95_v39, %v94_v38  ;;  %v97_v42 = vld [vmem:[#allocation7 + $0x58] sm:$0xff]  ;;  %v98_v44 = vld [vmem:[#allocation7 + $0x60] sm:$0xff]  ;;  %v99_v45 = vld [vmem:[#allocation7 + $0x68] sm:$0xff] }
  0x41   :  { %462 = vmatprep.subr.bf16.mxu1 %v461_v31  ;;  %v477_v43 = vpack.c.bf16 %v97_v42, %v96_v40  ;;  %v481_v46 = vpack.c.bf16 %v99_v45, %v98_v44  ;;  %v100_v47 = vld [vmem:[#allocation7 + $0x70] sm:$0xff]  ;;  %v101_v48 = vld [vmem:[#allocation7 + $0x78] sm:$0xff] }
  0x42   :  { %436 = vmatpush3.bf16.msra.mxu0 %v433_v8  ;;  %v485_v49 = vpack.c.bf16 %v101_v48, %v100_v47  ;;  %v317_v50 = vld [vmem:[%s705_s2] ss:$0 sm:$0xff] }
  0x43   :  { %438 = vmatprep.subr.bf16.mxu0 %v437_v12  ;;  %v318_v10 = vld [vmem:[%s707_s4] ss:$0 sm:$0xff] }
  0x44   :  { %464 = vmatpush3.bf16.msra.mxu1 %v461_v31 }
  0x45   :  { %466 = vmatprep.subr.bf16.mxu1 %v465_v34 }
  0x46   :  { %440 = vmatpush3.bf16.msra.mxu0 %v437_v12 }
  0x47   :  { %442 = vmatprep.subr.bf16.mxu0 %v441_v15 }
  0x48   :  { %468 = vmatpush3.bf16.msra.mxu1 %v465_v34 }
  0x49   :  { %470 = vmatprep.subr.bf16.mxu1 %v469_v37 }
  0x4a   :  { %444 = vmatpush3.bf16.msra.mxu0 %v441_v15 }
  0x4b   :  { %446 = vmatprep.subr.bf16.mxu0 %v445_v18 }
  0x4c   :  { %472 = vmatpush3.bf16.msra.mxu1 %v469_v37 }
  0x4d   :  { %474 = vmatprep.subr.bf16.mxu1 %v473_v41 }
  0x4e   :  { %448 = vmatpush3.bf16.msra.mxu0 %v445_v18 }
  0x4f   :  { %450 = vmatprep.subr.bf16.mxu0 %v449_v21 }
  0x50   :  { %476 = vmatpush3.bf16.msra.mxu1 %v473_v41 }
  0x51   :  { %478 = vmatprep.subr.bf16.mxu1 %v477_v43 }
  0x52   :  { %452 = vmatpush3.bf16.msra.mxu0 %v449_v21 }
  0x53   :  { %454 = vmatprep.subr.bf16.mxu0 %v453_v24 }
  0x54   :  { %480 = vmatpush3.bf16.msra.mxu1 %v477_v43 }
  0x55   :  { %482 = vmatprep.subr.bf16.mxu1 %v481_v46 }
  0x56   :  { %456 = vmatpush3.bf16.msra.mxu0 %v453_v24 }
  0x58   :  { %484 = vmatpush3.bf16.msra.mxu1 %v481_v46 }
  0x59   :  { %388 = vmatmul.mubr.f32.vlgmr.msra.gmra.mrb[0].mxu0 %v69_v25  ;;  %486 = vmatprep.subr.bf16.mxu1 %v485_v49 }
  0x5c   :  { %488 = vmatpush3.bf16.msra.mxu1 %v485_v49 }
 0x12c   :  { %v389_v51 = vpop.f32.mrb[0].mxu0 }
 0x12d   :  { %v181_v52 = vadd.f32 %v389_v51, %v317_v50  ;;  %v175_v53 = vpop.f32.mrb[1].mxu0 }
 0x12e   :  { %v176_v54 = vadd.f32 %v317_v50, %v175_v53 }
 0x12f   :  { %v185_v55 = vmul.f32 %v181_v52, %v181_v52 }
 0x130   :  { %v184_v56 = vmul.f32 %v176_v54, %v176_v54 }
 0x131   :  { %v187_v57 = vmul.f32 %v185_v55, %v181_v52 }
 0x132   :  { %v186_v58 = vmul.f32 %v184_v56, %v176_v54 }
 0x133   :  { %v189_v59 = vmul.f32 0.044715, %v187_v57 }
 0x134   :  { %v188_v60 = vmul.f32 0.044715, %v186_v58 }
 0x135   :  { %v191_v61 = vadd.f32 %v189_v59, %v181_v52 }
 0x136   :  { %v190_v62 = vadd.f32 %v188_v60, %v176_v54 }
 0x137   :  { %v193_v63 = vmul.f32 0.7978846, %v191_v61 }
 0x138   :  { %v192_v0 = vmul.f32 0.7978846, %v190_v62 }
 0x139   :  { %496 = vtanh.f32 %v193_v63 }
 0x13a   :  { %498 = vtanh.f32 %v192_v0 }
 0x143   :  { %v497_v1 = vpop.eup %496 }
 0x144   :  { %v499_v2 = vpop.eup %498  ;;  %v197_v3 = vadd.f32 1.0, %v497_v1 }
 0x145   :  { %v196_v4 = vadd.f32 1.0, %v499_v2 }
 0x146   :  { %v199_v5 = vmul.f32 0.5, %v197_v3 }
 0x147   :  { %v198_v6 = vmul.f32 0.5, %v196_v4 }
 0x148   :  { %v201_v8 = vmul.f32 %v199_v5, %v181_v52 }
 0x149   :  { %v200_v7 = vmul.f32 %v198_v6, %v176_v54 }
 0x14b   :  { %422 = vmatprep.mubr.f32.mxu1 %v200_v7 }
 0x14c   :  { %423 = vmatmul.mubr.f32.vlgmr.msra.gmra.mrb[0].mxu1 %v201_v8 }
 0x21f   :  { %v424_v9 = vpop.f32.mrb[0].mxu1 }
 0x220   :  { %v270_v11 = vpop.f32.mrb[1].mxu1  ;;  %v296_v12 = vadd.f32 %v424_v9, %v318_v10 }
 0x221   :  { %v295_v13 = vadd.f32 %v318_v10, %v270_v11 }
 0x222   :  { %298 = vst [vmem:[#allocation8 + $0x8] sm:$0xff] %v296_v12 }
 0x223   :  { %297 = vst [vmem:[#allocation8] sm:$0xff] %v295_v13 }
 0x224   :  { %577 = shalt.err (!%p574_p0)
}
 0x225   :  { %s578_s13 = scalar_lea.hbm %s708_s5, 256 }
 0x226   :  { %p579_p1 = scmp.ne.s32.totalorder %s708_s5, %s578_s13  ;;  %p582_p2 = scmp.lt.u32.totalorder %s578_s13, %s708_s5 }
 0x228   :  { %p584_p3 = pnand %p582_p2, %p579_p1 }
 0x22a   :  { %587 = shalt.err (!%p584_p3)
}
 0x22b   :  { %310 = dma.vmem_to_hbm [thread:$0]  %s305_s9, 256, %s708_s5, [#allocation4], %s596_s30, %s596_s30, %s597_s6  }
 0x22c   :  { %592 = dma.done.wait [#allocation4], 256  }
 0x22d   :  { %593 = vsyncadd [#allocation4], 4294967040 }
 0x22e   :  { %314 = vsyncpa [#allocation3], 1 }
 0x22f   :  { %315 = vsyncpa [#allocation6], 1 }
 0x230   :  { %316 = vsyncpa [#allocation4], 1 }

</bundles_post_ra>
